<compile_context>
chip_gen: v5e
topology: v5e:2x2
jax: 0.10.0
libtpu: 0.0.40
codegen_flags: <defaults>
</compile_context>

<pallas_src>
import math

import jax
import jax.numpy as jnp
from jax.experimental import pallas as pl
from jax.experimental.pallas import tpu as pltpu

_LANES = 128
_SUBLANES = 8
_MAX_TILE_ROWS = 8192  # upper bound on rows per grid step (packed rows)


def _round_up(x, m):
    return (x + m - 1) // m * m


def _vmem_capacity_bytes():
    """Per-chip VMEM capacity (bytes); conservative v7x default if unknown."""
    try:
        info = pltpu.get_tpu_info()
        cap = getattr(info, "vmem_capacity_bytes", None)
        if cap:
            return int(cap)
    except Exception:
        pass
    return 64 * 1024 * 1024


# ----------------------------------------------------------------------------
# Pallas kernel: fused matmul + bias (value head)
# ----------------------------------------------------------------------------
def _value_head_kernel(x_ref, w_ref, b_ref, o_ref):
    # (tile, lanes) @ (lanes, n_out) on the MXU with f32 accumulation; bias
    # epilogue fused.  Inputs may be bf16 or f32; accumulation is always f32.
    acc = jnp.dot(x_ref[...], w_ref[...], preferred_element_type=jnp.float32)
    o_ref[...] = (acc + b_ref[...]).astype(o_ref.dtype)


def pallas_linear(x, w, b, *, max_tile_rows=_MAX_TILE_ROWS):
    """y = x @ w + b.   x:(M,K)  w:(K,1)  b:(1,)  ->  (M,1).

    Memory-bound value head.  The dominant operand x is DMA'd lane-dense by
    packing `pack = 128 // K` consecutive rows into one 128-lane row and using
    a block-diagonal weight, tiled tall over (packed) rows with a
    VMEM-budgeted tile, ragged last block, and "parallel" megacore sharding.
    """
    M, K = x.shape
    K2, N = w.shape
    assert K == K2 and N == 1, (K, K2, N)

    out_dtype = jnp.promote_types(x.dtype, w.dtype)
    itemsize = jnp.dtype(x.dtype).itemsize

    # --- lane-pack a narrow K: fold `pack` consecutive rows into one row. ----
    pack = _LANES // K if (K < _LANES and _LANES % K == 0) else 1

    m_orig = M
    if M % pack:
        # Tiny pad (< pack rows) only when the batch isn't a multiple of pack.
        x = jnp.pad(x, ((0, pack - M % pack), (0, 0)))
        M = x.shape[0]

    rows = M // pack          # packed row count
    lanes = pack * K          # 128 when packed, else K
    n_out = pack              # outputs per packed row (1 when unpacked)

    x_packed = x.reshape(rows, lanes)  # contiguous reshape: free
    if pack > 1:
        # Block-diagonal weight: column c holds w on rows c*K:(c+1)*K.
        eye = jnp.eye(pack, dtype=w.dtype)
        w_packed = (eye[:, None, :] * w.reshape(1, K, 1)).reshape(lanes, pack)
    else:
        w_packed = w
    b_row = jnp.broadcast_to(b.reshape(1, 1).astype(jnp.float32), (1, n_out))

    # --- tile selection: VMEM-budgeted, tall, multiple of 8 sublanes. --------
    lane_padded = _round_up(lanes, _LANES)
    vmem_budget = _vmem_capacity_bytes() // 4          # share for x double-buffer
    tile_cap = (vmem_budget // (2 * lane_padded * itemsize))
    tile_cap = max(_SUBLANES, tile_cap - tile_cap % _SUBLANES)

    tile = min(max_tile_rows, tile_cap, _round_up(rows, _SUBLANES))
    tile = max(_SUBLANES, tile - tile % _SUBLANES)

    num_tiles = pl.cdiv(rows, tile)
    if num_tiles > 1 and num_tiles % 2:
        # Best-effort even step count so v7x's 2 TensorCores get balanced work.
        num_tiles += 1
        tile = max(_SUBLANES, _round_up(pl.cdiv(rows, num_tiles), _SUBLANES))
        num_tiles = pl.cdiv(rows, tile)

    cost = pl.CostEstimate(
        flops=2 * rows * lanes * n_out,
        transcendentals=0,
        bytes_accessed=int(
            itemsize * (rows * lanes + lanes * n_out)
            + 4 * n_out
            + jnp.dtype(out_dtype).itemsize * rows * n_out
        ),
    )

    out = pl.pallas_call(
        _value_head_kernel,
        out_shape=jax.ShapeDtypeStruct((rows, n_out), out_dtype),
        grid=(num_tiles,),
        in_specs=[
            pl.BlockSpec((tile, lanes), lambda i: (i, 0)),   # row tile of x
            pl.BlockSpec((lanes, n_out), lambda i: (0, 0)),  # weight, resident
            pl.BlockSpec((1, n_out), lambda i: (0, 0)),      # bias, resident
        ],
        out_specs=pl.BlockSpec((tile, n_out), lambda i: (i, 0)),
        compiler_params=pltpu.CompilerParams(
            dimension_semantics=("parallel",),
            vmem_limit_bytes=min(_vmem_capacity_bytes() // 2, 100 * 1024 * 1024),
        ),
        cost_estimate=cost,
    )(x_packed, w_packed, b_row)

    value = out.reshape(M, 1)        # (rows, pack) -> (M, 1): contiguous, free
    if M != m_orig:
        value = value[:m_orig]       # only when the tiny pack-pad was taken
    return value


# ----------------------------------------------------------------------------
# Parameters (deterministic synthetic init mirroring nn.Linear defaults)
# ----------------------------------------------------------------------------
def make_params(key, num_inputs):
    kw, kb = jax.random.split(key)
    bound = 1.0 / math.sqrt(num_inputs)
    # Weight stored pre-transposed as (in, out) so no .T / reshape per forward.
    w = jax.random.uniform(kw, (num_inputs, 1), jnp.float32, -bound, bound)
    b = jax.random.uniform(kb, (1,), jnp.float32, -bound, bound)
    return {"critic_linear_w": w, "critic_linear_b": b}


# ----------------------------------------------------------------------------
# LinearBase.forward (recurrent=False path)
# ----------------------------------------------------------------------------
def linear_base_forward(params, inputs, rnn_hxs, masks):
    # actor / critic are nn.Identity -> zero-copy passthrough.
    hidden_actor = inputs
    hidden_critic = inputs
    value = pallas_linear(
        hidden_critic, params["critic_linear_w"], params["critic_linear_b"]
    )
    # TODO(synk): NNBase._forward_gru (GRU branch) not implemented — LinearBase
    # is constructed with recurrent=False, so that branch never executes and
    # rnn_hxs is returned unchanged (masks unused), exactly as in PyTorch.
    return value, hidden_actor, rnn_hxs


if __name__ == "__main__":
    key = jax.random.PRNGKey(0)
    k_param, k_in, k_big = jax.random.split(key, 3)

    batch = 2
    num_inputs = 32  # LinearBase: hidden_size == output_size == num_inputs

    params = make_params(k_param, num_inputs)

    inputs = jax.random.normal(k_in, (batch, num_inputs), dtype=jnp.float32)
    rnn_hxs = jnp.zeros((batch, 1), jnp.float32)   # recurrent_hidden_state_size == 1
    masks = jnp.ones((batch, 1), jnp.float32)

    value, hidden_actor, hxs = linear_base_forward(params, inputs, rnn_hxs, masks)
    value, hidden_actor, hxs = jax.block_until_ready((value, hidden_actor, hxs))

    assert value.shape == (batch, 1)
    assert hidden_actor.shape == (batch, num_inputs)
    assert hxs.shape == (batch, 1)

    # Correctness vs plain-JAX reference.
    ref = inputs @ params["critic_linear_w"] + params["critic_linear_b"][None, :]
    assert jnp.allclose(value, ref, atol=1e-5, rtol=1e-5)
    assert bool(jnp.array_equal(hidden_actor, inputs))
    assert bool(jnp.array_equal(hxs, rnn_hxs))
    assert bool(jnp.all(jnp.isfinite(value)))

    # Multi-step "parallel" grid with ragged last block and a batch that is not
    # a multiple of the pack factor (exercises pad + even-step balancing).
    big = jax.random.normal(k_big, (1201, num_inputs), dtype=jnp.float32)
    v_big = jax.block_until_ready(
        pallas_linear(big, params["critic_linear_w"], params["critic_linear_b"],
                      max_tile_rows=64)
    )
    ref_big = big @ params["critic_linear_w"] + params["critic_linear_b"][None, :]
    assert v_big.shape == (1201, 1)
    assert jnp.allclose(v_big, ref_big, atol=1e-4, rtol=1e-5)

    # bf16 end-to-end (no wrapper astype): halves HBM reads of the dominant operand.
    big_bf16 = big.astype(jnp.bfloat16)
    w_bf16 = params["critic_linear_w"].astype(jnp.bfloat16)
    v_bf16 = jax.block_until_ready(
        pallas_linear(big_bf16, w_bf16, params["critic_linear_b"])
    )
    ref_bf16 = (big_bf16.astype(jnp.float32) @ w_bf16.astype(jnp.float32)
                + params["critic_linear_b"][None, :])
    assert v_bf16.shape == (1201, 1)
    assert jnp.allclose(v_bf16.astype(jnp.float32), ref_bf16, atol=1e-1, rtol=5e-2)

    print("KERNEL_OK")
</pallas_src>

<mosaic_0001>
module attributes {stable_mosaic.version = 11 : i64} {
  func.func @_value_head_kernel(%arg0: i32, %arg1: memref<8x128xf32, #tpu.memory_space<vmem>>, %arg2: memref<128x4xf32, #tpu.memory_space<vmem>>, %arg3: memref<1x4xf32, #tpu.memory_space<vmem>>, %arg4: memref<8x4xf32, #tpu.memory_space<vmem>>) attributes {dimension_semantics = [#tpu.dimension_semantics<parallel>], iteration_bounds = array<i64: 1>, scalar_prefetch = 0 : i64, scratch_operands = 0 : i64, tpu.core_type = #tpu.core_type<tc>, window_params = [{transform_indices = @transform_0, window_bounds = array<i64: 8, 128>}, {pipeline_mode = #tpu.pipeline_mode<synchronous>, transform_indices = @transform_1, window_bounds = array<i64: 128, 4>}, {pipeline_mode = #tpu.pipeline_mode<synchronous>, transform_indices = @transform_2, window_bounds = array<i64: 1, 4>}, {transform_indices = @transform_3, window_bounds = array<i64: 8, 4>}]} {
    %c0 = arith.constant 0 : index
    %c0_0 = arith.constant 0 : index
    %0 = vector.load %arg1[%c0, %c0_0] : memref<8x128xf32, #tpu.memory_space<vmem>>, vector<8x128xf32>
    %c0_1 = arith.constant 0 : index
    %c0_2 = arith.constant 0 : index
    %1 = vector.load %arg2[%c0_1, %c0_2] : memref<128x4xf32, #tpu.memory_space<vmem>>, vector<128x4xf32>
    %cst = arith.constant dense<0.000000e+00> : vector<8x4xf32>
    %2 = tpu.matmul %0, %1, %cst {dimension_numbers = #tpu.dot_dimension_numbers<[1], [0], [0], [1], [0, 0, 1, 1], [], []>} : vector<8x128xf32>, vector<128x4xf32>, vector<8x4xf32> -> vector<8x4xf32>
    %c0_3 = arith.constant 0 : index
    %c0_4 = arith.constant 0 : index
    %3 = vector.load %arg3[%c0_3, %c0_4] : memref<1x4xf32, #tpu.memory_space<vmem>>, vector<1x4xf32>
    %4 = vector.broadcast %3 : vector<1x4xf32> to vector<8x4xf32>
    %5 = arith.addf %2, %4 : vector<8x4xf32>
    %c0_5 = arith.constant 0 : index
    %c0_6 = arith.constant 0 : index
    %6 = vector.load %arg4[%c0_5, %c0_6] : memref<8x4xf32, #tpu.memory_space<vmem>>, vector<8x4xf32>
    tpu.vector_store %arg4[%c0_5, %c0_6], %5 {strides = array<i32>} : memref<8x4xf32, #tpu.memory_space<vmem>>, vector<8x4xf32>,
    return
  }
  func.func @transform_0(%arg0: i32) -> (i32, i32) {
    %c0_i32 = arith.constant 0 : i32
    %c0_i32_0 = arith.constant 0 : i32
    return %arg0, %c0_i32 : i32, i32
  }
  func.func @transform_1(%arg0: i32) -> (i32, i32) {
    %c0_i32 = arith.constant 0 : i32
    %c0_i32_0 = arith.constant 0 : i32
    %c0_i32_1 = arith.constant 0 : i32
    return %c0_i32, %c0_i32_0 : i32, i32
  }
  func.func @transform_2(%arg0: i32) -> (i32, i32) {
    %c0_i32 = arith.constant 0 : i32
    %c0_i32_0 = arith.constant 0 : i32
    %c0_i32_1 = arith.constant 0 : i32
    return %c0_i32, %c0_i32_0 : i32, i32
  }
  func.func @transform_3(%arg0: i32) -> (i32, i32) {
    %c0_i32 = arith.constant 0 : i32
    %c0_i32_0 = arith.constant 0 : i32
    return %arg0, %c0_i32 : i32, i32
  }
}

</mosaic_0001>

<bundles_post_ra>
// kernel: tpu_custom_call.1
= control target key start
LH: loop header
LB: loop body
LE: loop exit
PB: predicated region body
PF: predicated region fallthrough
CT: control target
= control target key end

     0   :  { %8 = vsyncpa [#allocation3], 0  ;;  %vm56_vm0 = vcmask 31744   ;;  %s186_s0 = inlined_call_operand.vmem [shape: f32[1,128], index: 0, kind: input, shape index: {}]   ;;  %s187_s1 = inlined_call_operand.vmem [shape: f32[128,4], index: 1, kind: input, shape index: {}]   ;;  %s188_s2 = inlined_call_operand.vmem [shape: f32[1,4], index: 2, kind: input, shape index: {}]   ;;  %s189_s3 = inlined_call_operand.hbm [shape: f32[1,4], index: 3, kind: output, shape index: {}]  }
   0x1   :  { %v31_v0 = vld [vmem:[%s187_s1 + $0x78] sm:$0xff]  ;;  %v30_v1 = vld [vmem:[%s187_s1 + $0x70] sm:$0xff]  ;;  %v29_v2 = vld [vmem:[%s187_s1 + $0x68] sm:$0xff] }
   0x2   :  { %36 = vmatpush.msra.mxu0 %v31_v0  ;;  %v28_v3 = vld [vmem:[%s187_s1 + $0x60] sm:$0xff]  ;;  %v27_v4 = vld [vmem:[%s187_s1 + $0x58] sm:$0xff]  ;;  %v26_v5 = vld [vmem:[%s187_s1 + $0x50] sm:$0xff] }
   0x3   :  { %v25_v6 = vld [vmem:[%s187_s1 + $0x48] sm:$0xff]  ;;  %v24_v7 = vld [vmem:[%s187_s1 + $0x40] sm:$0xff]  ;;  %v23_v8 = vld [vmem:[%s187_s1 + $0x38] sm:$0xff] }
   0x4   :  { %37 = vmatpush.msra.mxu0 %v30_v1  ;;  %v22_v9 = vld [vmem:[%s187_s1 + $0x30] sm:$0xff]  ;;  %v21_v10 = vld [vmem:[%s187_s1 + $0x28] sm:$0xff]  ;;  %v20_v11 = vld [vmem:[%s187_s1 + $0x20] sm:$0xff] }
   0x5   :  { %v19_v12 = vld [vmem:[%s187_s1 + $0x18] sm:$0xff]  ;;  %v18_v13 = vld [vmem:[%s187_s1 + $0x10] sm:$0xff]  ;;  %v17_v14 = vld [vmem:[%s187_s1 + $0x8] sm:$0xff] }
   0x6   :  { %38 = vmatpush.msra.mxu0 %v29_v2  ;;  %v16_v15 = vld [vmem:[%s187_s1] sm:$0xff] }
   0x7   :  { %v15_v16 = vld [vmem:[%s186_s0] sm:$0xff] }
   0x8   :  { %39 = vmatpush.msra.mxu0 %v28_v3  ;;  %v79_v17 = vld [vmem:[%s188_s2] ss:$0 sm:$0xff] }
   0xa   :  { %40 = vmatpush.msra.mxu0 %v27_v4 }
   0xc   :  { %41 = vmatpush.msra.mxu0 %v26_v5 }
   0xe   :  { %42 = vmatpush.msra.mxu0 %v25_v6 }
  0x10   :  { %43 = vmatpush.msra.mxu0 %v24_v7 }
  0x12   :  { %44 = vmatpush.msra.mxu0 %v23_v8 }
  0x14   :  { %45 = vmatpush.msra.mxu0 %v22_v9 }
  0x16   :  { %46 = vmatpush.msra.mxu0 %v21_v10 }
  0x18   :  { %47 = vmatpush.msra.mxu0 %v20_v11 }
  0x1a   :  { %48 = vmatpush.msra.mxu0 %v19_v12 }
  0x1c   :  { %49 = vmatpush.msra.mxu0 %v18_v13 }
  0x1e   :  { %50 = vmatpush.msra.mxu0 %v17_v14 }
  0x20   :  { %51 = vmatpush.msra.mxu0 %v16_v15 }
  0x21   :  { %52 = vmatmul.f32.vlgmr.msra.gmra.mxu0 %v15_v16 }
  0x9e   :  { %v53_v18 = vpop.f32.mrf.mxu0 }
  0x9f   :  { %v54_v19 = vadd.f32 %v79_v17, %v53_v18 }
  0xa1   :  { %57 = vst.msk [vmem:[#allocation2] sm:$0xff] %vm56_vm0, %v54_v19 }
  0xa2   :  { %61 = vsyncadd [#allocation3], 112  ;;  %s64_s1 = sshll.u32 %s189_s3, 4  ;;  %s106_s23 = smov [#allocation2]   ;;  %s65_s1 = int_to_ptr.hbm [resolvable:$true] %s64_s1 }
  0xa3   :  { %s62_s24 = sshll.u32 %s106_s23, 4  ;;  %s107_s0 = smov 16   ;;  %s63_s24 = int_to_ptr.vmem [resolvable:$true] %s62_s24 }
  0xa4   :  { %s108_s25 = smov 1  }
  0xa5   :  { %70 = dma.vmem_to_hbm [thread:$0]  %s63_s24, 16, %s65_s1, [#allocation3], %s107_s0, %s107_s0, %s108_s25  }
  0xa6   :  { %104 = dma.done.wait [#allocation3], 128  }
  0xa7   :  { %105 = vsyncadd [#allocation3], 4294967168 }
  0xa8   :  { %75 = vsyncpa [#allocation3], 1 }

</bundles_post_ra>
